<compile_context>
chip_gen: v7x
topology: tpu7x:2x2x1
jax: 0.10.0
libtpu: 0.0.40
codegen_flags: <defaults>
</compile_context>

<pallas_src>
import jax
import jax.numpy as jnp
from jax import lax
from jax.experimental import pallas as pl
from jax.experimental.pallas import tpu as pltpu

# ---- problem sizes (small, consistent with the module) ----
B = 8      # batch
D = 16     # input_shape = (D,)
H = 32     # layer_neurons
A = 4      # action_space_dimension

LOG_SIGMA_MIN = -20.0
LOG_SIGMA_MAX = 2.0

_INV_SQRT2 = 0.7071067811865476


def _gelu_exact(x):
    # torch.nn.functional.gelu default = exact erf-based GELU
    return 0.5 * x * (1.0 + lax.erf(x * _INV_SQRT2))


def actor_kernel(x_ref, w1_ref, w2_ref, wh_ref, b_ref, out_ref):
    """One batch-tile of the actor forward pass.

    x_ref  : [TB, D]    state tile
    w1_ref : [D, H]     layer1 weight (stored [in, out])
    w2_ref : [H, H]     layer2 weight
    wh_ref : [H, 2A]    fused head weight  [W_mu | W_log_sigma]
    b_ref  : [3, H]     packed biases (row0=b1, row1=b2, row2=[b_mu|b_ls|0...])
    out_ref: [TB, 2A]   fused output       [mu | sigma]
    """
    x = x_ref[...]                                                     # [TB, D]

    b1 = b_ref[0:1, :]                                                 # [1, H]
    b2 = b_ref[1:2, :]                                                 # [1, H]
    bh = b_ref[2:3, 0:2 * A]                                           # [1, 2A]

    h = jnp.dot(x, w1_ref[...], preferred_element_type=jnp.float32) + b1
    h = _gelu_exact(h)

    h = jnp.dot(h, w2_ref[...], preferred_element_type=jnp.float32) + b2
    h = _gelu_exact(h)

    # Single fused head matmul: [TB, 2A] = [mu_pre | log_sigma_pre]
    z = jnp.dot(h, wh_ref[...], preferred_element_type=jnp.float32) + bh

    # Lanes [0, A)   -> mu (pass through)
    # Lanes [A, 2A)  -> sigma = exp(clip(log_sigma))
    # Elementwise select avoids lane slices / concat inside the kernel;
    # clip is applied to all lanes (harmless for the mu half) so exp never overflows.
    lane = lax.broadcasted_iota(jnp.int32, z.shape, 1)
    z_clipped = jnp.clip(z, LOG_SIGMA_MIN, LOG_SIGMA_MAX)
    out_ref[...] = jnp.where(lane < A, z, jnp.exp(z_clipped))


def pack_params(params):
    """Pack the 8 torch-style tensors into 4 kernel operands."""
    (w1, b1, w2, b2, wmu, bmu, wls, bls) = params
    assert 2 * A <= H, "bias packing assumes 2*A <= H"
    w_head = jnp.concatenate([wmu, wls], axis=1)                       # [H, 2A]
    b_head = jnp.concatenate(
        [bmu, bls, jnp.zeros((1, H - 2 * A), jnp.float32)], axis=1)    # [1, H]
    b_packed = jnp.concatenate([b1, b2, b_head], axis=0)               # [3, H]
    return w1, w2, w_head, b_packed


def actor_forward(state, params):
    w1, w2, w_head, b_packed = pack_params(params)

    batch = state.shape[0]
    tile_b = batch if batch <= 256 else 256
    assert batch % tile_b == 0, "batch must be a multiple of the tile size"
    grid = (batch // tile_b,)

    fused = pl.pallas_call(
        actor_kernel,
        out_shape=jax.ShapeDtypeStruct((batch, 2 * A), jnp.float32),
        grid_spec=pltpu.PrefetchScalarGridSpec(
            num_scalar_prefetch=0,
            grid=grid,
            in_specs=[
                pl.BlockSpec((tile_b, D), lambda i: (i, 0)),   # state: tiled over batch
                pl.BlockSpec((D, H), lambda i: (0, 0)),        # weights: resident
                pl.BlockSpec((H, H), lambda i: (0, 0)),
                pl.BlockSpec((H, 2 * A), lambda i: (0, 0)),
                pl.BlockSpec((3, H), lambda i: (0, 0)),
            ],
            out_specs=pl.BlockSpec((tile_b, 2 * A), lambda i: (i, 0)),
        ),
        compiler_params=pltpu.CompilerParams(
            dimension_semantics=("parallel",)),                # shards across TCs on v7x
    )(state, w1, w2, w_head, b_packed)

    mu = fused[:, :A]
    sigma = fused[:, A:]
    return mu, sigma


def init_params(key):
    ks = jax.random.split(key, 8)

    def lin(kw, kb, fan_in, fan_out):
        bound = 1.0 / jnp.sqrt(fan_in)
        w = jax.random.uniform(kw, (fan_in, fan_out), jnp.float32, -bound, bound)
        b = jax.random.uniform(kb, (1, fan_out), jnp.float32, -bound, bound)
        return w, b

    w1, b1 = lin(ks[0], ks[1], D, H)
    w2, b2 = lin(ks[2], ks[3], H, H)
    wmu, bmu = lin(ks[4], ks[5], H, A)
    wls, bls = lin(ks[6], ks[7], H, A)
    return (w1, b1, w2, b2, wmu, bmu, wls, bls)


def actor_forward_ref(state, params):
    (w1, b1, w2, b2, wmu, bmu, wls, bls) = params
    h = _gelu_exact(state @ w1 + b1)
    h = _gelu_exact(h @ w2 + b2)
    mu = h @ wmu + bmu
    ls = jnp.clip(h @ wls + bls, LOG_SIGMA_MIN, LOG_SIGMA_MAX)
    return mu, jnp.exp(ls)


if __name__ == "__main__":
    key = jax.random.PRNGKey(0)
    k_state, k_params = jax.random.split(key)
    state = jax.random.normal(k_state, (B, D), jnp.float32)
    params = init_params(k_params)

    mu, sigma = actor_forward(state, params)
    jax.block_until_ready((mu, sigma))

    mu_ref, sigma_ref = actor_forward_ref(state, params)
    assert jnp.allclose(mu, mu_ref, atol=1e-5, rtol=1e-5)
    assert jnp.allclose(sigma, sigma_ref, atol=1e-5, rtol=1e-5)

    print("KERNEL_OK")
</pallas_src>

<mosaic_0001>
module attributes {stable_mosaic.version = 11 : i64} {
  func.func @actor_kernel(%arg0: i32, %arg1: memref<8x16xf32, #tpu.memory_space<vmem>>, %arg2: memref<16x32xf32, #tpu.memory_space<vmem>>, %arg3: memref<32x32xf32, #tpu.memory_space<vmem>>, %arg4: memref<32x8xf32, #tpu.memory_space<vmem>>, %arg5: memref<3x32xf32, #tpu.memory_space<vmem>>, %arg6: memref<8x8xf32, #tpu.memory_space<vmem>>) attributes {dimension_semantics = [#tpu.dimension_semantics<parallel>], iteration_bounds = array<i64: 1>, scalar_prefetch = 0 : i64, scratch_operands = 0 : i64, tpu.core_type = #tpu.core_type<tc>, window_params = [{transform_indices = @transform_0, window_bounds = array<i64: 8, 16>}, {pipeline_mode = #tpu.pipeline_mode<synchronous>, transform_indices = @transform_1, window_bounds = array<i64: 16, 32>}, {pipeline_mode = #tpu.pipeline_mode<synchronous>, transform_indices = @transform_2, window_bounds = array<i64: 32, 32>}, {pipeline_mode = #tpu.pipeline_mode<synchronous>, transform_indices = @transform_3, window_bounds = array<i64: 32, 8>}, {pipeline_mode = #tpu.pipeline_mode<synchronous>, transform_indices = @transform_4, window_bounds = array<i64: 3, 32>}, {transform_indices = @transform_5, window_bounds = array<i64: 8, 8>}]} {
    %c0 = arith.constant 0 : index
    %c0_0 = arith.constant 0 : index
    %0 = vector.load %arg1[%c0, %c0_0] : memref<8x16xf32, #tpu.memory_space<vmem>>, vector<8x16xf32>
    %c0_1 = arith.constant 0 : index
    %c0_2 = arith.constant 0 : index
    %1 = vector.load %arg5[%c0_1, %c0_2] : memref<3x32xf32, #tpu.memory_space<vmem>>, vector<1x32xf32>
    %c1 = arith.constant 1 : index
    %c0_3 = arith.constant 0 : index
    %2 = vector.load %arg5[%c1, %c0_3] : memref<3x32xf32, #tpu.memory_space<vmem>>, vector<1x32xf32>
    %c2 = arith.constant 2 : index
    %c0_4 = arith.constant 0 : index
    %3 = vector.load %arg5[%c2, %c0_4] : memref<3x32xf32, #tpu.memory_space<vmem>>, vector<1x8xf32>
    %c0_5 = arith.constant 0 : index
    %c0_6 = arith.constant 0 : index
    %4 = vector.load %arg2[%c0_5, %c0_6] : memref<16x32xf32, #tpu.memory_space<vmem>>, vector<16x32xf32>
    %cst = arith.constant dense<0.000000e+00> : vector<8x32xf32>
    %5 = tpu.matmul %0, %4, %cst {dimension_numbers = #tpu.dot_dimension_numbers<[1], [0], [0], [1], [0, 0, 1, 1], [], []>} : vector<8x16xf32>, vector<16x32xf32>, vector<8x32xf32> -> vector<8x32xf32>
    %6 = vector.broadcast %1 : vector<1x32xf32> to vector<8x32xf32>
    %7 = arith.addf %5, %6 : vector<8x32xf32>
    %cst_7 = arith.constant 5.000000e-01 : f32
    %8 = vector.broadcast %cst_7 : f32 to vector<8x32xf32>
    %9 = arith.mulf %8, %7 : vector<8x32xf32>
    %cst_8 = arith.constant 0.707106769 : f32
    %10 = vector.broadcast %cst_8 : f32 to vector<8x32xf32>
    %11 = arith.mulf %7, %10 : vector<8x32xf32>
    %12 = math.erf %11 : vector<8x32xf32>
    %cst_9 = arith.constant 1.000000e+00 : f32
    %13 = vector.broadcast %cst_9 : f32 to vector<8x32xf32>
    %14 = arith.addf %13, %12 : vector<8x32xf32>
    %15 = arith.mulf %9, %14 : vector<8x32xf32>
    %c0_10 = arith.constant 0 : index
    %c0_11 = arith.constant 0 : index
    %16 = vector.load %arg3[%c0_10, %c0_11] : memref<32x32xf32, #tpu.memory_space<vmem>>, vector<32x32xf32>
    %cst_12 = arith.constant dense<0.000000e+00> : vector<8x32xf32>
    %17 = tpu.matmul %15, %16, %cst_12 {dimension_numbers = #tpu.dot_dimension_numbers<[1], [0], [0], [1], [0, 0, 1, 1], [], []>} : vector<8x32xf32>, vector<32x32xf32>, vector<8x32xf32> -> vector<8x32xf32>
    %18 = vector.broadcast %2 : vector<1x32xf32> to vector<8x32xf32>
    %19 = arith.addf %17, %18 : vector<8x32xf32>
    %cst_13 = arith.constant 5.000000e-01 : f32
    %20 = vector.broadcast %cst_13 : f32 to vector<8x32xf32>
    %21 = arith.mulf %20, %19 : vector<8x32xf32>
    %cst_14 = arith.constant 0.707106769 : f32
    %22 = vector.broadcast %cst_14 : f32 to vector<8x32xf32>
    %23 = arith.mulf %19, %22 : vector<8x32xf32>
    %24 = math.erf %23 : vector<8x32xf32>
    %cst_15 = arith.constant 1.000000e+00 : f32
    %25 = vector.broadcast %cst_15 : f32 to vector<8x32xf32>
    %26 = arith.addf %25, %24 : vector<8x32xf32>
    %27 = arith.mulf %21, %26 : vector<8x32xf32>
    %c0_16 = arith.constant 0 : index
    %c0_17 = arith.constant 0 : index
    %28 = vector.load %arg4[%c0_16, %c0_17] : memref<32x8xf32, #tpu.memory_space<vmem>>, vector<32x8xf32>
    %cst_18 = arith.constant dense<0.000000e+00> : vector<8x8xf32>
    %29 = tpu.matmul %27, %28, %cst_18 {dimension_numbers = #tpu.dot_dimension_numbers<[1], [0], [0], [1], [0, 0, 1, 1], [], []>} : vector<8x32xf32>, vector<32x8xf32>, vector<8x8xf32> -> vector<8x8xf32>
    %30 = vector.broadcast %3 : vector<1x8xf32> to vector<8x8xf32>
    %31 = arith.addf %29, %30 : vector<8x8xf32>
    %32 = tpu.iota {dimensions = array<i32: 1>} : vector<8x8xi32>
    %cst_19 = arith.constant -2.000000e+01 : f32
    %cst_20 = arith.constant 2.000000e+00 : f32
    %33 = vector.broadcast %cst_19 : f32 to vector<8x8xf32>
    %34 = arith.maximumf %33, %31 : vector<8x8xf32>
    %35 = vector.broadcast %cst_20 : f32 to vector<8x8xf32>
    %36 = arith.minimumf %35, %34 : vector<8x8xf32>
    %c4_i32 = arith.constant 4 : i32
    %37 = vector.broadcast %c4_i32 : i32 to vector<8x8xi32>
    %38 = arith.cmpi slt, %32, %37 : vector<8x8xi32>
    %39 = math.exp %36 : vector<8x8xf32>
    %40 = arith.select %38, %31, %39 : vector<8x8xi1>, vector<8x8xf32>
    %c0_21 = arith.constant 0 : index
    %c0_22 = arith.constant 0 : index
    %41 = vector.load %arg6[%c0_21, %c0_22] : memref<8x8xf32, #tpu.memory_space<vmem>>, vector<8x8xf32>
    tpu.vector_store %arg6[%c0_21, %c0_22], %40 {strides = array<i32>} : memref<8x8xf32, #tpu.memory_space<vmem>>, vector<8x8xf32>,
    return
  }
  func.func @transform_0(%arg0: i32) -> (i32, i32) {
    %c0_i32 = arith.constant 0 : i32
    %c0_i32_0 = arith.constant 0 : i32
    return %arg0, %c0_i32 : i32, i32
  }
  func.func @transform_1(%arg0: i32) -> (i32, i32) {
    %c0_i32 = arith.constant 0 : i32
    %c0_i32_0 = arith.constant 0 : i32
    %c0_i32_1 = arith.constant 0 : i32
    return %c0_i32, %c0_i32_0 : i32, i32
  }
  func.func @transform_2(%arg0: i32) -> (i32, i32) {
    %c0_i32 = arith.constant 0 : i32
    %c0_i32_0 = arith.constant 0 : i32
    %c0_i32_1 = arith.constant 0 : i32
    return %c0_i32, %c0_i32_0 : i32, i32
  }
  func.func @transform_3(%arg0: i32) -> (i32, i32) {
    %c0_i32 = arith.constant 0 : i32
    %c0_i32_0 = arith.constant 0 : i32
    %c0_i32_1 = arith.constant 0 : i32
    return %c0_i32, %c0_i32_0 : i32, i32
  }
  func.func @transform_4(%arg0: i32) -> (i32, i32) {
    %c0_i32 = arith.constant 0 : i32
    %c0_i32_0 = arith.constant 0 : i32
    %c0_i32_1 = arith.constant 0 : i32
    return %c0_i32, %c0_i32_0 : i32, i32
  }
  func.func @transform_5(%arg0: i32) -> (i32, i32) {
    %c0_i32 = arith.constant 0 : i32
    %c0_i32_0 = arith.constant 0 : i32
    return %arg0, %c0_i32 : i32, i32
  }
}

</mosaic_0001>

<bundles_post_ra>
// kernel: tpu_custom_call.1
= control target key start
LH: loop header
LB: loop body
LE: loop exit
PB: predicated region body
PF: predicated region fallthrough
CT: control target
= control target key end

     0   :  { %10 = vsyncpa [#allocation3], 0  ;;  %s540_s0 = inlined_call_operand.vmem [shape: f32[8,16], index: 0, kind: input, shape index: {}]   ;;  %s541_s1 = inlined_call_operand.hbm [shape: f32[16,32], index: 1, kind: input, shape index: {}]   ;;  %s542_s2 = inlined_call_operand.vmem [shape: f32[32,32], index: 2, kind: input, shape index: {}]   ;;  %s543_s3 = inlined_call_operand.vmem [shape: f32[32,8], index: 3, kind: input, shape index: {}]   ;;  %s544_s4 = inlined_call_operand.vmem [shape: f32[3,32], index: 4, kind: input, shape index: {}]   ;;  %s545_s5 = inlined_call_operand.hbm [shape: f32[8,8], index: 5, kind: output, shape index: {}]  }
   0x1   :  { %11 = vsyncpa [#allocation4], 0  ;;  %s441_s18 = smov [#allocation2]   ;;  %s393_s22 = scalar_lea.hbm %s541_s1, 256 }
   0x2   :  { %s19_s19 = sshll.u32 %s441_s18, 4  ;;  %p394_p0 = scmp.ne.s32.totalorder %s541_s1, %s393_s22  ;;  %s20_s19 = int_to_ptr.vmem [resolvable:$true] %s19_s19 }
   0x3   :  { %p397_p1 = scmp.lt.u32.totalorder %s393_s22, %s541_s1 }
   0x5   :  { %p399_p2 = pnand %p397_p1, %p394_p0 }
   0x7   :  { %402 = shalt.err (!%p399_p2)
}
   0x8   :  { %s403_s27 = scalar_lea.vmem %s20_s19, 256  ;;  %p408_p4 = scmp.lt.s32.totalorder %s20_s19, %s20_s19 }
   0x9   :  { %p404_p3 = scmp.ne.s32.totalorder %s20_s19, %s403_s27  ;;  %p409_p5 = scmp.lt.s32.totalorder %s403_s27, %s403_s27 }
   0xb   :  { %p410_p6 = por %p409_p5, %p408_p4 }
   0xd   :  { %p411_p7 = pnand %p410_p6, %p404_p3 }
   0xf   :  { %414 = shalt.err (!%p411_p7)
}
  0x10   :  { %s442_s28 = smov 128   ;;  %s443_s29 = smov 8  }
  0x11   :  { %25 = dma.hbm_to_vmem [thread:$0]  %s541_s1, 256, %s20_s19, [#allocation3], %s442_s28, %s442_s28, %s443_s29  }
  0x12   :  { %437 = dma.done.wait [#allocation3], 256  }
  0x13   :  { %438 = vsyncadd [#allocation3], 4294967040  ;;  %v444_v0 = vmov 0.0|0.0   ;;  %vm445_vm0 = vmmov 0   ;;  %v446_v1 = vmov 0.0   ;;  %v39_v2 = vld [vmem:[#allocation2] sm:$0xff]  ;;  %v292_v43 = vlaneseq }
  0x14   :  { %365 = vmatprep.subr.bf16.mxu0 %v444_v0  ;;  %340 = vmatprep.mubr.msk.f32.mxu0 %vm445_vm0, %v446_v1  ;;  %v40_v3 = vld [vmem:[#allocation2 + $0x8] sm:$0xff]  ;;  %v35_v5 = vld [vmem:[%s540_s0] sm:$0xff]  ;;  %vm45_vm1 = vcmask 130048   ;;  %v126_v9 = vld [vmem:[%s542_s2 + $0x10] sm:$0xff]  ;;  %vm132_vm2 = vcmask 261120   ;;  %vm300_vm4 = vcmask 64512  }
  0x15   :  { %368 = vmatprep.subr.bf16.mxu1 %v444_v0  ;;  %351 = vmatprep.mubr.msk.f32.mxu1 %vm445_vm0, %v446_v1  ;;  %v366_v4 = vpack.c.bf16 %v40_v3, %v39_v2  ;;  %v124_v6 = vld [vmem:[%s542_s2] sm:$0xff]  ;;  %v125_v7 = vld [vmem:[%s542_s2 + $0x8] sm:$0xff]  ;;  %v127_v10 = vld [vmem:[%s542_s2 + $0x18] sm:$0xff]  ;;  %v293_v44 = vand.u32 127, %v292_v43 }
  0x16   :  { %v369_v8 = vpack.c.bf16 %v125_v7, %v124_v6  ;;  %v372_v11 = vpack.c.bf16 %v127_v10, %v126_v9  ;;  %v317_v12 = vld [vmem:[%s544_s4] ss:$0 sm:$0xff]  ;;  %v212_v22 = vld [vmem:[%s543_s3 + $0x8] sm:$0xff]  ;;  %v213_v24 = vld [vmem:[%s543_s3 + $0x10] sm:$0xff] }
  0x17   :  { %367 = vmatpush3.bf16.msra.mxu0 %v366_v4  ;;  %v211_v21 = vld [vmem:[%s543_s3] sm:$0xff]  ;;  %v214_v25 = vld [vmem:[%s543_s3 + $0x18] sm:$0xff]  ;;  %s447_s3 = smov [#allocation5]   ;;  %vm296_vm3 = vcmp.lt.s32.totalorder %v293_v44, 4 }
  0x18   :  { %374 = vmatprep.subr.bf16.mxu0 %v444_v0  ;;  %370 = vmatpush3.bf16.msra.mxu1 %v369_v8  ;;  %v375_v23 = vpack.c.bf16 %v212_v22, %v211_v21  ;;  %v378_v26 = vpack.c.bf16 %v214_v25, %v213_v24  ;;  %v319_v27 = vld [vmem:[%s544_s4 + $0x1] ss:$0 sm:$0xff]  ;;  %v321_v36 = vld [vmem:[%s544_s4 + $0x2] ss:$0 sm:$0xff]  ;;  %s308_s28 = sshll.u32 %s447_s3, 4  ;;  %s309_s28 = int_to_ptr.vmem [resolvable:$true] %s308_s28 }
  0x19   :  { %371 = vmatprep.subr.bf16.mxu1 %v444_v0  ;;  %s415_s29 = scalar_lea.vmem %s309_s28, 128  ;;  %p420_p9 = scmp.lt.s32.totalorder %s309_s28, %s309_s28 }
  0x1a   :  { %341 = vmatmul.mubr.msk.f32.vlgmr.msra.gmra.mrb[0].mxu0 %vm45_vm1, %v35_v5  ;;  %p416_p8 = scmp.ne.s32.totalorder %s309_s28, %s415_s29  ;;  %p421_p10 = scmp.lt.s32.totalorder %s415_s29, %s415_s29 }
  0x1b   :  { %362 = vmatprep.mubr.msk.f32.mxu0 %vm445_vm0, %v446_v1  ;;  %376 = vmatpush3.bf16.msra.mxu0 %v375_v23 }
  0x1c   :  { %373 = vmatpush3.bf16.msra.mxu1 %v372_v11  ;;  %377 = vmatprep.subr.bf16.mxu0 %v444_v0  ;;  %p422_p11 = por %p421_p10, %p420_p9 }
  0x1e   :  { %p423_p12 = pnand %p422_p11, %p416_p8 }
  0x1f   :  { %379 = vmatpush3.bf16.msra.mxu0 %v378_v26 }
  0xed   :  { %v115_v13 = vpop.f32.mrb[0].mxu0 }
  0xee   :  { %v116_v14 = vadd.f32 %v317_v12, %v115_v13  ;;  %v342_v15 = vpop.f32.mrb[1].mxu0 }
  0xf0   :  { %v120_v16 = vmul.f32 0.70710677, %v116_v14  ;;  %v119_v18 = vmul.f32 0.5, %v116_v14 }
  0xf2   :  { %387 = verf.f32 %v120_v16 }
  0xfc   :  { %v388_v17 = vpop.eup %387 }
  0xfd   :  { %v122_v19 = vadd.f32 1.0, %v388_v17 }
  0xff   :  { %v123_v20 = vmul.f32 %v122_v19, %v119_v18 }
 0x101   :  { %352 = vmatmul.mubr.msk.f32.vlgmr.msra.gmra.mrb[0].mxu1 %vm132_vm2, %v123_v20 }
 0x1d4   :  { %v202_v28 = vpop.f32.mrb[0].mxu1 }
 0x1d5   :  { %v203_v29 = vadd.f32 %v319_v27, %v202_v28  ;;  %v353_v30 = vpop.f32.mrb[1].mxu1 }
 0x1d7   :  { %v207_v31 = vmul.f32 0.70710677, %v203_v29  ;;  %v206_v33 = vmul.f32 0.5, %v203_v29 }
 0x1d9   :  { %389 = verf.f32 %v207_v31 }
 0x1e3   :  { %v390_v32 = vpop.eup %389 }
 0x1e4   :  { %v209_v34 = vadd.f32 1.0, %v390_v32 }
 0x1e6   :  { %v210_v35 = vmul.f32 %v209_v34, %v206_v33 }
 0x1e8   :  { %363 = vmatmul.mubr.msk.f32.vlgmr.msra.gmra.mrb[2].mxu0 %vm132_vm2, %v210_v35 }
 0x2bb   :  { %v288_v37 = vpop.f32.mrb[2].mxu0 }
 0x2bc   :  { %v289_v38 = vadd.f32 %v321_v36, %v288_v37  ;;  %v364_v39 = vpop.f32.mrb[3].mxu0 }
 0x2be   :  { %v294_v40 = vmax.f32 %v289_v38, -20.0 }
 0x2c0   :  { %v295_v41 = vmin.f32 %v294_v40, 2.0 }
 0x2c2   :  { %v297_v42 = vmul.f32 1.442695, %v295_v41 }
 0x2c4   :  { %391 = vpow2.f32 %v297_v42 }
 0x2ce   :  { %v392_v45 = vpop.eup %391 }
 0x2cf   :  { %v299_v46 = vsel %vm296_vm3, %v289_v38, %v392_v45 }
 0x2d0   :  { %301 = vst.msk [vmem:[#allocation5] sm:$0xff] %vm300_vm4, %v299_v46 }
 0x2d1   :  { %426 = shalt.err (!%p423_p12)
}
 0x2d2   :  { %s427_s6 = scalar_lea.hbm %s545_s5, 128 }
 0x2d3   :  { %p428_p13 = scmp.ne.s32.totalorder %s545_s5, %s427_s6  ;;  %p431_p0 = scmp.lt.u32.totalorder %s427_s6, %s545_s5 }
 0x2d5   :  { %p433_p1 = pnand %p431_p0, %p428_p13 }
 0x2d7   :  { %436 = shalt.err (!%p433_p1)
}
 0x2d8   :  { %311 = dma.vmem_to_hbm [thread:$0]  %s309_s28, 128, %s545_s5, [#allocation4]  }
 0x2d9   :  { %439 = dma.done.wait [#allocation4], 128  }
 0x2da   :  { %440 = vsyncadd [#allocation4], 4294967168 }
 0x2db   :  { %315 = vsyncpa [#allocation3], 1 }
 0x2dc   :  { %316 = vsyncpa [#allocation4], 1 }

</bundles_post_ra>
